<compile_context>
chip_gen: v5e
topology: v5e:2x2
jax: 0.10.0
libtpu: 0.0.40
codegen_flags: <defaults>
</compile_context>

<pallas_src>
import math

import numpy as np
import jax
import jax.numpy as jnp
from jax.experimental import pallas as pl
from jax.experimental.pallas import tpu as pltpu


# ----------------------------------------------------------------------------
# Kernel: one row-tile of the bias-free linear projection.
#   out[tile_m, out_lanes] = x[tile_m, x_lanes] @ W[x_lanes, out_lanes]
# ----------------------------------------------------------------------------
def _embed_kernel(x_ref, w_ref, o_ref):
    o_ref[...] = jnp.dot(
        x_ref[...], w_ref[...], preferred_element_type=jnp.float32
    ).astype(o_ref.dtype)


def _choose_tile_m(m_rows, x_lanes, out_lanes, elem_bytes):
    """Largest row tile that fits a conservative VMEM budget, keeping >=2 grid
    steps when there is enough work (v7x dual-TC sharding of the parallel axis)."""
    if m_rows < 16:
        return m_rows                            # single block == full extent
    # Double-buffered x block (lane-padded to >=128 lanes) + double-buffered out block.
    per_row = 2 * elem_bytes * (max(128, x_lanes) + out_lanes)
    budget = 24 << 20                            # headroom under scoped-VMEM limits (v7x: 64 MiB phys)
    tile = min(2048, max(8, budget // per_row))
    tile = min(tile, -(-m_rows // 2))            # >=2 grid steps
    return max(8, (tile // 8) * 8)               # sublane multiple for non-final blocks


def time_feature_embedding(x, w):
    """x: [..., freq] -> [..., d_model], with w: [freq, d_model] (= torch W^T)."""
    freq, d_model = w.shape
    assert x.shape[-1] == freq
    lead_shape = x.shape[:-1]

    x2 = x.reshape(-1, freq)                     # free row-major reshape
    M = x2.shape[0]

    # Lane-dense output fold when d_model < 128: process r original rows per
    # kernel row with a block-diagonal weight so out_lanes is a multiple of 128.
    r = 1
    if d_model < 128:
        r = math.lcm(128, d_model) // d_model
        if M % r != 0:
            r = 1                                # remainder rows -> plain (unfolded) path

    m_rows = M // r
    x_lanes = r * freq
    out_lanes = r * d_model
    if r > 1:
        x2 = x2.reshape(m_rows, x_lanes)         # free row-major reshape
        w_k = jnp.kron(jnp.eye(r, dtype=w.dtype), w)   # block_diag(W, ..., W)
    else:
        w_k = w

    elem = jnp.dtype(x.dtype).itemsize
    tile_m = _choose_tile_m(m_rows, x_lanes, out_lanes, elem)
    grid = (pl.cdiv(m_rows, tile_m),)            # ragged last block handled by Pallas

    out = pl.pallas_call(
        _embed_kernel,
        out_shape=jax.ShapeDtypeStruct((m_rows, out_lanes), x.dtype),
        grid=grid,
        in_specs=[
            pl.BlockSpec((tile_m, x_lanes), lambda i: (i, 0)),       # row tile of x
            pl.BlockSpec((x_lanes, out_lanes), lambda i: (0, 0)),    # weight, resident in VMEM
        ],
        out_specs=pl.BlockSpec((tile_m, out_lanes), lambda i: (i, 0)),
        compiler_params=pltpu.CompilerParams(
            dimension_semantics=("parallel",),
            # Big tiles exceed v5e's 16 MiB default scoped VMEM; 48 MiB is safe
            # on all generations (<= v7x's 64 MiB physical per TC).
            vmem_limit_bytes=48 << 20,
        ),
        cost_estimate=pl.CostEstimate(
            flops=2 * M * freq * d_model,
            transcendentals=0,
            bytes_accessed=(M * freq + M * d_model + freq * d_model) * elem,
        ),
    )(x2, w_k)

    # (m_rows, r*d_model) -> (..., d_model): free row-major reshape, recovers
    # exactly the per-row x @ W layout.
    return out.reshape(*lead_shape, d_model)


# ----------------------------------------------------------------------------
# Parameter construction mimicking torch.nn.Linear(freq, d_model, bias=False):
# weight ~ U(-1/sqrt(freq), 1/sqrt(freq)), stored transposed as [freq, d_model]
# so the kernel computes x @ W.
# ----------------------------------------------------------------------------
def init_params(key, freq, d_model):
    bound = 1.0 / np.sqrt(freq)
    return jax.random.uniform(key, (freq, d_model), jnp.float32, -bound, bound)


# ----------------------------------------------------------------------------
if __name__ == "__main__":
    # Small shapes consistent with the module: x = time-feature tensor
    # [batch, seq_len, freq=4], projected to d_model.
    B, seq_len, freq, d_model = 2, 8, 4, 32

    key = jax.random.PRNGKey(0)
    k_w, k_x, k_x2 = jax.random.split(key, 3)
    w = init_params(k_w, freq, d_model)
    x = jax.random.normal(k_x, (B, seq_len, freq), jnp.float32)

    out = jax.block_until_ready(time_feature_embedding(x, w))

    # Pure-JAX reference: bias-free linear along the last axis.
    ref = x @ w
    assert out.shape == ref.shape == (B, seq_len, d_model)
    np.testing.assert_allclose(np.asarray(out), np.asarray(ref), rtol=1e-5, atol=1e-5)

    # Also exercise the unfolded fallback path (row count not divisible by r).
    x_odd = jax.random.normal(k_x2, (3, 5, freq), jnp.float32)
    out_odd = jax.block_until_ready(time_feature_embedding(x_odd, w))
    np.testing.assert_allclose(np.asarray(out_odd), np.asarray(x_odd @ w),
                               rtol=1e-5, atol=1e-5)

    print("KERNEL_OK")
</pallas_src>

<mosaic_0001>
module attributes {stable_mosaic.version = 11 : i64} {
  func.func @_embed_kernel(%arg0: i32, %arg1: memref<4x16xf32, #tpu.memory_space<vmem>>, %arg2: memref<16x128xf32, #tpu.memory_space<vmem>>, %arg3: memref<4x128xf32, #tpu.memory_space<vmem>>) attributes {dimension_semantics = [#tpu.dimension_semantics<parallel>], iteration_bounds = array<i64: 1>, scalar_prefetch = 0 : i64, scratch_operands = 0 : i64, tpu.core_type = #tpu.core_type<tc>, window_params = [{transform_indices = @transform_0, window_bounds = array<i64: 4, 16>}, {pipeline_mode = #tpu.pipeline_mode<synchronous>, transform_indices = @transform_1, window_bounds = array<i64: 16, 128>}, {transform_indices = @transform_2, window_bounds = array<i64: 4, 128>}]} {
    %c0 = arith.constant 0 : index
    %c0_0 = arith.constant 0 : index
    %0 = vector.load %arg1[%c0, %c0_0] : memref<4x16xf32, #tpu.memory_space<vmem>>, vector<4x16xf32>
    %c0_1 = arith.constant 0 : index
    %c0_2 = arith.constant 0 : index
    %1 = vector.load %arg2[%c0_1, %c0_2] : memref<16x128xf32, #tpu.memory_space<vmem>>, vector<16x128xf32>
    %cst = arith.constant dense<0.000000e+00> : vector<4x128xf32>
    %2 = tpu.matmul %0, %1, %cst {dimension_numbers = #tpu.dot_dimension_numbers<[1], [0], [0], [1], [0, 0, 1, 1], [], []>} : vector<4x16xf32>, vector<16x128xf32>, vector<4x128xf32> -> vector<4x128xf32>
    %c0_3 = arith.constant 0 : index
    %c0_4 = arith.constant 0 : index
    %3 = vector.load %arg3[%c0_3, %c0_4] : memref<4x128xf32, #tpu.memory_space<vmem>>, vector<4x128xf32>
    tpu.vector_store %arg3[%c0_3, %c0_4], %2 {strides = array<i32>} : memref<4x128xf32, #tpu.memory_space<vmem>>, vector<4x128xf32>,
    return
  }
  func.func @transform_0(%arg0: i32) -> (i32, i32) {
    %c0_i32 = arith.constant 0 : i32
    %c0_i32_0 = arith.constant 0 : i32
    return %arg0, %c0_i32 : i32, i32
  }
  func.func @transform_1(%arg0: i32) -> (i32, i32) {
    %c0_i32 = arith.constant 0 : i32
    %c0_i32_0 = arith.constant 0 : i32
    %c0_i32_1 = arith.constant 0 : i32
    return %c0_i32, %c0_i32_0 : i32, i32
  }
  func.func @transform_2(%arg0: i32) -> (i32, i32) {
    %c0_i32 = arith.constant 0 : i32
    %c0_i32_0 = arith.constant 0 : i32
    return %arg0, %c0_i32 : i32, i32
  }
}

</mosaic_0001>

<bundles_post_ra>
// kernel: tpu_custom_call.1
= control target key start
LH: loop header
LB: loop body
LE: loop exit
PB: predicated region body
PF: predicated region fallthrough
CT: control target
= control target key end

     0   :  { %7 = vsyncpa [#allocation3], 0  ;;  %s201_s0 = inlined_call_operand.hbm [shape: f32[4,16], index: 0, kind: input, shape index: {}]   ;;  %s202_s1 = inlined_call_operand.hbm [shape: f32[16,128], index: 1, kind: input, shape index: {}]   ;;  %s203_s2 = inlined_call_operand.hbm [shape: f32[4,128], index: 2, kind: output, shape index: {}]  }
   0x1   :  { %8 = vsyncpa [#allocation6], 0 }
   0x2   :  { %9 = vsyncpa [#allocation4], 0  ;;  %s15_s11 = sshll.u32 %s201_s0, 4  ;;  %s172_s12 = smov [#allocation2]   ;;  %s16_s11 = int_to_ptr.hbm [resolvable:$true] %s15_s11 }
   0x3   :  { %s17_s13 = sshll.u32 %s172_s12, 4  ;;  %s25_s16 = sshll.u32 %s202_s1, 4  ;;  %s18_s13 = int_to_ptr.vmem [resolvable:$true] %s17_s13  ;;  %s26_s16 = int_to_ptr.hbm [resolvable:$true] %s25_s16 }
   0x4   :  { %20 = dma.hbm_to_vmem [thread:$0]  %s16_s11, 64, %s18_s13, [#allocation3]  }
   0x5   :  { %s173_s17 = smov [#allocation5]   ;;  %s174_s19 = smov 128  }
   0x6   :  { %s27_s18 = sshll.u32 %s173_s17, 4  ;;  %s175_s20 = smov 8   ;;  %s28_s18 = int_to_ptr.vmem [resolvable:$true] %s27_s18 }
   0x7   :  { %33 = dma.hbm_to_vmem [thread:$0]  %s26_s16, 256, %s28_s18, [#allocation6], %s174_s19, %s174_s19, %s175_s20  }
   0x8   :  { %166 = dma.done.wait [#allocation3], 64  }
   0x9   :  { %167 = vsyncadd [#allocation3], 4294967232 }
   0xa   :  { %168 = dma.done.wait [#allocation6], 256  }
   0xb   :  { %169 = vsyncadd [#allocation6], 4294967040  ;;  %v44_v0 = vld [vmem:[#allocation5 + $0x8] sm:$0xff]  ;;  %v43_v1 = vld [vmem:[#allocation5] sm:$0xff]  ;;  %vm45_vm0 = vcmask 130048   ;;  %s176_s0 = smov [#allocation7]  }
   0xc   :  { %63 = vmatpush.msra.mxu0 %v44_v0  ;;  %v42_v2 = vld [vmem:[#allocation2] sm:$0xf]  ;;  %s75_s1 = sshll.u32 %s176_s0, 4  ;;  %s77_s23 = sshll.u32 %s203_s2, 4  ;;  %s76_s1 = int_to_ptr.vmem [resolvable:$true] %s75_s1  ;;  %s78_s23 = int_to_ptr.hbm [resolvable:$true] %s77_s23 }
   0xe   :  { %64 = vmatpush.msra.mxu0 %v43_v1 }
   0xf   :  { %88 = vmatmul.msk.f32.vlgmr.msra.gmra.mxu0 %vm45_vm0, %v42_v2 }
  0x8c   :  { %v66_v3 = vpop.f32.mrf.mxu0 }
  0x8d   :  { %69 = vst [vmem:[#allocation7] sm:$0xf] %v66_v3 }
  0x8e   :  { %80 = dma.vmem_to_hbm [thread:$0]  %s76_s1, 64, %s78_s23, [#allocation4]  }
  0x8f   :  { %170 = dma.done.wait [#allocation4], 64  }
  0x90   :  { %171 = vsyncadd [#allocation4], 4294967232 }
  0x91   :  { %85 = vsyncpa [#allocation3], 1 }
  0x92   :  { %86 = vsyncpa [#allocation6], 1 }
  0x93   :  { %87 = vsyncpa [#allocation4], 1 }

</bundles_post_ra>
